<compile_context>
chip_gen: v7x
topology: tpu7x:2x2x1
jax: 0.10.0
libtpu: 0.0.40
codegen_flags: <defaults>
</compile_context>

<pallas_src>
import functools

import jax
import jax.numpy as jnp
from jax import lax
from jax.experimental import pallas as pl
from jax.experimental.pallas import tpu as pltpu


def _round_up(x, m):
    return (x + m - 1) // m * m


def _embed_kernel(ids_ref, word_ref, pos_ref, out_ref, *, vocab_size, use_onehot):
    """One grid step = one (batch b, seq-block j) tile of TS tokens.

    ids_ref  : VMEM (1, TS, 1) int32   token ids for this block (sublane-major)
    word_ref : VMEM (V, D)             resident word-embedding table
    pos_ref  : VMEM (TS, D)            position-embedding rows for this block
    out_ref  : VMEM (1, TS, D)         output tile
    """
    ts = ids_ref.shape[1]
    ids = ids_ref[0]                                    # (TS, 1), ids on sublanes

    if use_onehot:
        # One-hot gather on the MXU: onehot[t, v] = (ids[t] == v).
        vocab_iota = lax.broadcasted_iota(jnp.int32, (ts, vocab_size), 1)
        onehot = (jnp.broadcast_to(ids, (ts, vocab_size)) == vocab_iota)
        onehot = onehot.astype(jnp.bfloat16)

        w = word_ref[...]
        w_hi = w.astype(jnp.bfloat16)
        tok = jnp.dot(onehot, w_hi, preferred_element_type=jnp.float32)
        if word_ref.dtype == jnp.float32:
            # Second bf16 pass with the truncation residual: each output row is
            # a single product accumulated in f32, so the "gather" stays exact
            # to ~1e-7 for f32 tables independent of MXU precision defaults.
            w_lo = (w - w_hi.astype(jnp.float32)).astype(jnp.bfloat16)
            tok = tok + jnp.dot(onehot, w_lo, preferred_element_type=jnp.float32)
    else:
        # TODO(synk): for tables that do not fit VMEM, switch the word table to
        # memory_space=pl.ANY + chunked pltpu.make_async_copy row gather.
        tok = jnp.take(word_ref[...], ids[:, 0], axis=0).astype(jnp.float32)

    out_ref[0, :, :] = (tok + pos_ref[...].astype(jnp.float32)).astype(out_ref.dtype)


@jax.jit
def embeddings_forward(input_ids, word_emb, pos_emb):
    """input_ids: [B, S] int, word_emb: [V, D], pos_emb: [max_seq_len, D]."""
    B, S = input_ids.shape
    V, D = word_emb.shape
    P = pos_emb.shape[0]

    # Sequence-block size: a multiple of 8 sublanes, at most 256 tokens.
    TS = min(256, _round_up(S, 8))
    S_pad = _round_up(S, TS)
    n_blocks = S_pad // TS

    # Clamp ids for memory safety.  NOTE: PyTorch nn.Embedding raises on
    # out-of-range ids; we cannot raise from inside the kernel.
    ids = jnp.clip(input_ids.astype(jnp.int32), 0, V - 1)
    if S_pad != S:
        ids = jnp.pad(ids, ((0, 0), (0, S_pad - S)))
    # Sublane-major ids blocks: one (TS, 1) column per (b, j) grid step.
    ids_blocks = ids.reshape(B * n_blocks, TS, 1)

    # Position rows are consumed block-by-block; pad only if the padded
    # sequence is longer than max_seq_len so every accessed block is in range.
    pos_tab = pos_emb if P >= S_pad else jnp.pad(pos_emb, ((0, S_pad - P), (0, 0)))

    use_onehot = V <= 2048
    kernel = functools.partial(_embed_kernel, vocab_size=V, use_onehot=use_onehot)

    # VMEM budget (bytes): word table single-buffered, everything else 2x.
    vmem_bytes = (V * D * word_emb.dtype.itemsize
                  + 2 * TS * D * pos_tab.dtype.itemsize
                  + 2 * TS * 4
                  + 2 * TS * D * word_emb.dtype.itemsize)
    cparams = dict(dimension_semantics=("parallel", "parallel"))
    if vmem_bytes > (12 << 20):            # v5e's default scoped limit is 16 MiB
        try:
            vmem_cap = pltpu.get_tpu_info().vmem_capacity_bytes
        except Exception:                  # conservative fallback (v7x size)
            vmem_cap = 64 << 20
        cparams["vmem_limit_bytes"] = min(vmem_bytes + (4 << 20),
                                          vmem_cap - (8 << 20))

    out = pl.pallas_call(
        kernel,
        out_shape=jax.ShapeDtypeStruct((B, S_pad, D), word_emb.dtype),
        grid=(B, n_blocks),
        in_specs=[
            # Token ids for this (b, j) block.
            pl.BlockSpec((1, TS, 1), lambda b, j: (b * n_blocks + j, 0, 0)),
            # Word table: constant block index -> fetched once; single buffer.
            pl.BlockSpec((V, D), lambda b, j: (0, 0),
                         pipeline_mode=pl.Buffered(1)),
            # Position rows for sequence block j.
            pl.BlockSpec((TS, D), lambda b, j: (j, 0)),
        ],
        out_specs=pl.BlockSpec((1, TS, D), lambda b, j: (b, j, 0)),
        compiler_params=pltpu.CompilerParams(**cparams),
    )(ids_blocks, word_emb, pos_tab)

    if S_pad != S:
        out = out[:, :S, :]
    return out


if __name__ == "__main__":
    # Config (embedding_dim == hidden_dim as asserted in the module).
    vocab_size = 50
    max_seq_len = 16
    embedding_dim = 32
    batch_size = 2
    seq_len = 8

    key = jax.random.PRNGKey(0)
    k_word, k_pos, k_ids = jax.random.split(key, 3)

    # nn.init.normal_(weight, std=0.02) for both embedding tables.
    word_emb = 0.02 * jax.random.normal(
        k_word, (vocab_size, embedding_dim), dtype=jnp.float32
    )
    pos_emb = 0.02 * jax.random.normal(
        k_pos, (max_seq_len, embedding_dim), dtype=jnp.float32
    )
    input_ids = jax.random.randint(
        k_ids, (batch_size, seq_len), 0, vocab_size, dtype=jnp.int32
    )

    out = embeddings_forward(input_ids, word_emb, pos_emb)
    out = jax.block_until_ready(out)

    # Pure-JAX reference (eval-mode dropout == identity).
    ref = word_emb[input_ids] + pos_emb[:seq_len][None, :, :]
    assert out.shape == (batch_size, seq_len, embedding_dim)
    err = float(jnp.abs(out - ref).max())
    assert jnp.allclose(out, ref, atol=1e-5, rtol=1e-5), err

    print("KERNEL_OK")
</pallas_src>

<mosaic_0001>
module attributes {stable_mosaic.version = 11 : i64} {
  func.func @_embed_kernel(%arg0: i32, %arg1: i32, %arg2: memref<1x8x1xi32, #tpu.memory_space<vmem>>, %arg3: memref<50x32xf32, #tpu.memory_space<vmem>>, %arg4: memref<8x32xf32, #tpu.memory_space<vmem>>, %arg5: memref<1x8x32xf32, #tpu.memory_space<vmem>>) attributes {dimension_semantics = [#tpu.dimension_semantics<parallel>, #tpu.dimension_semantics<parallel>], iteration_bounds = array<i64: 2, 1>, scalar_prefetch = 0 : i64, scratch_operands = 0 : i64, tpu.core_type = #tpu.core_type<tc>, window_params = [{transform_indices = @transform_0, window_bounds = array<i64: 1, 8, 1>}, {pipeline_mode = #tpu.pipeline_mode<synchronous>, transform_indices = @transform_1, window_bounds = array<i64: 50, 32>}, {transform_indices = @transform_2, window_bounds = array<i64: 8, 32>}, {transform_indices = @transform_3, window_bounds = array<i64: 1, 8, 32>}]} {
    %c0 = arith.constant 0 : index
    %c0_0 = arith.constant 0 : index
    %c0_1 = arith.constant 0 : index
    %0 = vector.load %arg2[%c0, %c0_0, %c0_1] : memref<1x8x1xi32, #tpu.memory_space<vmem>>, vector<1x8x1xi32>
    %1 = vector.shape_cast %0 : vector<1x8x1xi32> to vector<8x1xi32>
    %2 = tpu.iota {dimensions = array<i32: 1>} : vector<8x50xi32>
    %3 = vector.shape_cast %1 : vector<8x1xi32> to vector<8x1xi32>
    %4 = vector.broadcast %3 : vector<8x1xi32> to vector<8x50xi32>
    %5 = arith.cmpi eq, %4, %2 : vector<8x50xi32>
    %6 = arith.extui %5 : vector<8x50xi1> to vector<8x50xi32>
    %7 = arith.sitofp %6 : vector<8x50xi32> to vector<8x50xf32>
    %8 = arith.truncf %7 : vector<8x50xf32> to vector<8x50xbf16>
    %c0_2 = arith.constant 0 : index
    %c0_3 = arith.constant 0 : index
    %9 = vector.load %arg3[%c0_2, %c0_3] : memref<50x32xf32, #tpu.memory_space<vmem>>, vector<50x32xf32>
    %10 = arith.truncf %9 : vector<50x32xf32> to vector<50x32xbf16>
    %cst = arith.constant dense<0.000000e+00> : vector<8x32xf32>
    %11 = tpu.matmul %8, %10, %cst {dimension_numbers = #tpu.dot_dimension_numbers<[1], [0], [0], [1], [0, 0, 1, 1], [], []>} : vector<8x50xbf16>, vector<50x32xbf16>, vector<8x32xf32> -> vector<8x32xf32>
    %12 = arith.extf %10 : vector<50x32xbf16> to vector<50x32xf32>
    %13 = arith.subf %9, %12 : vector<50x32xf32>
    %14 = arith.truncf %13 : vector<50x32xf32> to vector<50x32xbf16>
    %cst_4 = arith.constant dense<0.000000e+00> : vector<8x32xf32>
    %15 = tpu.matmul %8, %14, %cst_4 {dimension_numbers = #tpu.dot_dimension_numbers<[1], [0], [0], [1], [0, 0, 1, 1], [], []>} : vector<8x50xbf16>, vector<50x32xbf16>, vector<8x32xf32> -> vector<8x32xf32>
    %16 = arith.addf %11, %15 : vector<8x32xf32>
    %c0_5 = arith.constant 0 : index
    %c0_6 = arith.constant 0 : index
    %17 = vector.load %arg4[%c0_5, %c0_6] : memref<8x32xf32, #tpu.memory_space<vmem>>, vector<8x32xf32>
    %18 = arith.addf %16, %17 : vector<8x32xf32>
    %c0_7 = arith.constant 0 : index
    %c0_8 = arith.constant 0 : index
    %c0_9 = arith.constant 0 : index
    %19 = vector.load %arg5[%c0_7, %c0_8, %c0_9] : memref<1x8x32xf32, #tpu.memory_space<vmem>>, vector<1x8x32xf32>
    %20 = vector.shape_cast %19 : vector<1x8x32xf32> to vector<8x32xf32>
    %21 = vector.shape_cast %18 : vector<8x32xf32> to vector<1x8x32xf32>
    tpu.vector_store %arg5[%c0_7, %c0_8, %c0_9], %21 {strides = array<i32>} : memref<1x8x32xf32, #tpu.memory_space<vmem>>, vector<1x8x32xf32>,
    return
  }
  func.func @transform_0(%arg0: i32, %arg1: i32) -> (i32, i32, i32) {
    %c1_i32 = arith.constant 1 : i32
    %0 = arith.muli %arg0, %c1_i32 : i32
    %1 = arith.addi %0, %arg1 : i32
    %c0_i32 = arith.constant 0 : i32
    %c0_i32_0 = arith.constant 0 : i32
    %c0_i32_1 = arith.constant 0 : i32
    return %1, %c0_i32, %c0_i32_0 : i32, i32, i32
  }
  func.func @transform_1(%arg0: i32, %arg1: i32) -> (i32, i32) {
    %c0_i32 = arith.constant 0 : i32
    %c0_i32_0 = arith.constant 0 : i32
    %c0_i32_1 = arith.constant 0 : i32
    return %c0_i32, %c0_i32_0 : i32, i32
  }
  func.func @transform_2(%arg0: i32, %arg1: i32) -> (i32, i32) {
    %c0_i32 = arith.constant 0 : i32
    %c0_i32_0 = arith.constant 0 : i32
    return %arg1, %c0_i32 : i32, i32
  }
  func.func @transform_3(%arg0: i32, %arg1: i32) -> (i32, i32, i32) {
    %c0_i32 = arith.constant 0 : i32
    %c0_i32_0 = arith.constant 0 : i32
    return %arg0, %arg1, %c0_i32 : i32, i32, i32
  }
}

</mosaic_0001>

<bundles_post_ra>
// kernel: embeddings_forward.1
= control target key start
LH: loop header
LB: loop body
LE: loop exit
PB: predicated region body
PF: predicated region fallthrough
CT: control target
= control target key end

     0   :  { %8 = vsyncpa [#allocation3], 0  ;;  %s787_s0 = inlined_call_operand.vmem [shape: s32[2,8,1], index: 0, kind: input, shape index: {}]   ;;  %s788_s1 = inlined_call_operand.vmem [shape: f32[50,32], index: 1, kind: input, shape index: {}]   ;;  %s789_s2 = inlined_call_operand.vmem [shape: f32[16,32], index: 2, kind: input, shape index: {}]   ;;  %s790_s3 = inlined_call_operand.hbm [shape: f32[2,8,32], index: 3, kind: output, shape index: {}]  }
   0x1   :  { %10 = vsyncpa [#allocation3 + $0x1], 0  ;;  %s649_s12 = smov 0   ;;  %s651_s13 = smov 0  }
   0x2   :  { %s653_s14 = smov 0   ;;  %s655_s15 = smov 0  }
   0x3   :  { %s657_s16 = smov 0   ;;  %s659_s17 = smov 0  }
   0x4 LB: > { %s437_s18 = sadd.s32 4294967295, %s623_s17   ;;  %s438_s19 = sadd.s32 4294967294, %s623_s17   ;;  %s623_s17 = sphi %s659_s17, %s16_s17   ;;  %s619_s16 = sphi %s657_s16, %s797_s16   ;;  %s615_s15 = sphi %s655_s15, %s796_s15   ;;  %s611_s14 = sphi %s653_s14, %s795_s14   ;;  %s607_s13 = sphi %s651_s13, %s794_s13   ;;  %s603_s12 = sphi %s649_s12, %s793_s12  }
   0x5   : > { %s28_s20 = sadd.s32 1, %s619_s16  ;;  %s112_s21 = sadd.s32 1, %s611_s14 }
   0x6   : > { %p30_p0 = scmp.ge.s32.totalorder %s28_s20, 2  ;;  %p122_p1 = scmp.ne.s32.totalorder %s611_s14, %s607_s13 }
   0x7   : > { %p123_p2 = scmp.eq.s32.totalorder %s437_s18, 1  ;;  %p128_p3 = scmp.ne.s32.totalorder %s607_s13, %s603_s12 }
   0x8   : > { %s799_s20 = smov (%p30_p0, %s28_s20), 0  ;;  %p129_p5 = scmp.eq.s32.totalorder %s438_s19, 1 }
   0x9   : > { %p689_p4 = por %p123_p2, %p122_p1  ;;  %s107_s23 = ssub.s32 %s619_s16, %s799_s20 }
   0xa   : > { %p442_p6 = scmp.ge.s32.totalorder %s623_s17, 1  ;;  %p110_p7 = scmp.eq.s32.totalorder %s107_s23, 0 }
   0xb   : > { %p696_p8 = por %p129_p5, %p128_p3  ;;  %p166_p9 = scmp.lt.s32.totalorder %s623_s17, 3 }
   0xc   : > { %s702_s25 = scalar_select %p110_p7, %s611_s14, %s112_s21  }
   0xd   : > { %p167_p10 = pnand %p442_p6, %p166_p9 }
   0xe   : > { %p195_p11 = scmp.lt.s32.totalorder (!%p167_p10), %s615_s15, 1  ;;  %v215_v0 = vld [vmem:[%s788_s1] sm:$0xff] (!%p167_p10)  ;;  %v216_v1 = vld [vmem:[%s788_s1 + $0x8] sm:$0xff] (!%p167_p10)  ;;  %v217_v2 = vld [vmem:[%s788_s1 + $0x10] sm:$0xff] (!%p167_p10)  ;;  %v625_v3 = vmov (!%p167_p10), 0   ;;  %v626_v4 = vmov (!%p167_p10), 0.0   ;;  %v206_v34 = vlaneseq (!%p167_p10) }
   0xf   : > { %170 = sbr.rel (%p167_p10) target bundleno = 389 (0x185), region = 32  ;;  %544 = vset.pattern.permute.xlu0 (!%p167_p10), %v625_v3  ;;  %462 = vmatprep.subr.bf16.mxu0 (!%p167_p10), %v626_v4  ;;  %v222_v5 = vpack.c.bf16 (!%p167_p10), %v216_v1, %v215_v0  ;;  %v218_v6 = vld [vmem:[%s788_s1 + $0x18] sm:$0xff] (!%p167_p10)  ;;  %v219_v7 = vld [vmem:[%s788_s1 + $0x20] sm:$0xff] (!%p167_p10)  ;;  %v220_v8 = vld [vmem:[%s788_s1 + $0x28] sm:$0xff] (!%p167_p10)  ;;  %vm248_vm0 = vcmask (!%p167_p10), 1040384   ;;  %vm627_vm1 = vmmov (!%p167_p10), 0  }
  0x10   : > { %474 = vmatprep.subr.bf16.mxu1 (!%p167_p10), %v626_v4  ;;  %v223_v9 = vpack.c.bf16 (!%p167_p10), %v218_v6, %v217_v2  ;;  %v224_v10 = vpack.c.bf16 (!%p167_p10), %v220_v8, %v219_v7  ;;  %v221_v11 = vld [vmem:[%s788_s1 + $0x30] sm:$0x3] (!%p167_p10)  ;;  %470 = vmatprep.mubr.msk.bf16.mxu0 (!%p167_p10), %vm627_vm1, %v626_v4  ;;  %v207_v35 = vand.u32 (!%p167_p10), 127, %v206_v34  ;;  %vm244_vm3 = vcmask (!%p167_p10), 408576   ;;  %s191_s28 = sand.u32 (!%p167_p10), 1, %s607_s13   ;;  %v335_v41 = vld [vmem:[%s789_s2] sm:$0xff] (!%p167_p10) }
  0x11   : > { %v226_v12 = vunpack.c.l.bf16 (!%p167_p10), %v222_v5  ;;  %v227_v13 = vunpack.c.h.bf16 (!%p167_p10), %v222_v5  ;;  %475 = vmatpush3.bf16.msra.mxu1 (!%p167_p10), %v222_v5  ;;  %v225_v14 = vpack.c.bf16 (!%p167_p10), %v221_v11, %v221_v11  ;;  %482 = vmatprep.mubr.msk.bf16.mxu1 (!%p167_p10), %vm627_vm1, %v626_v4  ;;  %s443_s29 = sshll.u32 (!%p167_p10), %s191_s28, 3  ;;  %s449_s5 = sshll.u32 (!%p167_p10), %s615_s15, 7  ;;  %vm337_vm4 = vcmask (!%p167_p10), 261120  }
  0x12   : > { %476 = vmatprep.subr.bf16.mxu1 (!%p167_p10), %v626_v4  ;;  %v228_v15 = vunpack.c.l.bf16 (!%p167_p10), %v223_v9  ;;  %v229_v16 = vunpack.c.h.bf16 (!%p167_p10), %v223_v9  ;;  %v230_v17 = vunpack.c.l.bf16 (!%p167_p10), %v224_v10  ;;  %v231_v20 = vunpack.c.h.bf16 (!%p167_p10), %v224_v10  ;;  %s193_s6 = scalar_lea.vmem (!%p167_p10), [#allocation2], %s443_s29  ;;  %s740_s10 = scalar_lea.hbm (!%p167_p10), %s790_s3, %s449_s5 }
  0x13   : > { %v233_v18 = vsub.f32 (!%p167_p10), %v215_v0, %v226_v12  ;;  %v234_v19 = vsub.f32 (!%p167_p10), %v216_v1, %v227_v13  ;;  %v232_v24 = vunpack.c.l.bf16 (!%p167_p10), %v225_v14  ;;  %v293_v30 = vsel (!%p167_p10), %vm248_vm0, %v225_v14, 0  ;;  %s354_s7 = sshll.u32 (!%p167_p10), %s193_s6, 4  ;;  %s628_s18 = smov (!%p167_p10), [#allocation2]   ;;  %s742_s7 = int_to_ptr.vmem [resolvable:$true] %s354_s7 }
  0x14   : > { %v235_v22 = vsub.f32 (!%p167_p10), %v217_v2, %v228_v15  ;;  %v236_v23 = vsub.f32 (!%p167_p10), %v218_v6, %v229_v16  ;;  %v237_v26 = vsub.f32 (!%p167_p10), %v219_v7, %v230_v17  ;;  %v238_v28 = vsub.f32 (!%p167_p10), %v220_v8, %v231_v20  ;;  %s549_s19 = sshll.u32 (!%p167_p10), %s628_s18, 4  ;;  %s550_s19 = int_to_ptr.vmem [resolvable:$false] %s549_s19 }
  0x15   : > { %v240_v25 = vpack.c.bf16 (!%p167_p10), %v234_v19, %v233_v18  ;;  %477 = vmatpush3.bf16.msra.mxu1 (!%p167_p10), %v223_v9  ;;  %v239_v29 = vsub.f32 (!%p167_p10), %v221_v11, %v232_v24  ;;  %p552_p1 = scmp.lt.s32.totalorder (!%p167_p10), %s742_s7, %s550_s19 }
  0x16   : > { %s196_s11 = scalar_select %p195_p11, %s615_s15, 1  ;;  %478 = vmatprep.subr.bf16.mxu1 %v626_v4  ;;  %v241_v27 = vpack.c.bf16 %v236_v23, %v235_v22  ;;  %v242_v31 = vpack.c.bf16 %v238_v28, %v237_v26 }
  0x17   : > { %463 = vmatpush3.bf16.msra.mxu0 %v240_v25  ;;  %v243_v32 = vpack.c.bf16 %v239_v29, %v239_v29  ;;  %s340_s15 = scalar_lea.sflag [#allocation3], %s191_s28 }
  0x18   : > { %s444_s21 = sshll.u32 %s196_s11, 3  ;;  %464 = vmatprep.subr.bf16.mxu0 %v626_v4  ;;  %s545_s11 = scalar_lea.vmem %s742_s7, 128 }
  0x19   : > { %s198_s27 = scalar_lea.vmem %s787_s0, %s444_s21  ;;  %479 = vmatpush3.bf16.msra.mxu1 %v224_v10  ;;  %v250_v33 = vsel %vm248_vm0, %v243_v32, 0  ;;  %p546_p12 = scmp.ne.s32.totalorder %s742_s7, %s545_s11 }
  0x1a   : > { %v205_v21 = vld [vmem:[%s198_s27] sm:$0xff]  ;;  %480 = vmatprep.subr.bf16.mxu1 %v626_v4  ;;  %s551_s21 = scalar_lea.vmem %s550_s19, 256 }
  0x1b   : > { %209 = vperm.xlu0 %544, %v205_v21   ;;  %465 = vmatpush3.bf16.msra.mxu0 %v241_v27  ;;  %p547_p13 = pnand %p546_p12, %p689_p4  ;;  %p553_p2 = scmp.lt.s32.totalorder %s551_s21, %s545_s11 }
  0x1c   : > { %466 = vmatprep.subr.bf16.mxu0 %v626_v4 }
  0x1d   : > { %481 = vmatpush3.bf16.msra.mxu1 %v293_v30  ;;  %p548_p0 = pneg %p547_p13  ;;  %p554_p3 = por %p553_p2, %p552_p1 }
  0x1f   : > { %467 = vmatpush3.bf16.msra.mxu0 %v242_v31  ;;  %p555_p5 = pnand %p554_p3, %p548_p0 }
  0x20   : > { %468 = vmatprep.subr.bf16.mxu0 %v626_v4 }
  0x23   : > { %469 = vmatpush3.bf16.msra.mxu0 %v250_v33 }
  0x9a   : > { %v210_v36 = vpop.permute.xlu0 %209 }
  0x9b   : > { %vm211_vm2 = vcmp.eq.s32.totalorder %v210_v36, %v207_v35 }
  0x9c   : > { %v445_v37 = vsel %vm211_vm2, 1.0, %v626_v4 }
  0x9d   : > { %v214_v38 = vpack.c.bf16 %v445_v37, %v445_v37 }
  0x9f   : > { %471 = vmatmul.mubr.msk.bf16.vlgmr.msra.gmra.mrb[0].mxu0 %vm244_vm3, %v214_v38  ;;  %483 = vmatmul.mubr.msk.bf16.vlgmr.msra.gmra.mrb[0].mxu1 %vm244_vm3, %v214_v38 }
 0x172   : > { %v286_v39 = vpop.f32.mrb[0].mxu0  ;;  %v329_v40 = vpop.f32.mrb[0].mxu1 }
 0x173   : > { %v330_v42 = vadd.f32 %v329_v40, %v286_v39  ;;  %v472_v43 = vpop.f32.mrb[1].mxu0  ;;  %v484_v44 = vpop.f32.mrb[1].mxu1 }
 0x174   : > { %v289_v45 = vpop.f32.mrb[2].mxu0  ;;  %v332_v46 = vpop.f32.mrb[2].mxu1 }
 0x175   : > { %v336_v47 = vadd.f32 %v335_v41, %v330_v42  ;;  %v473_v48 = vpop.f32.mrb[3].mxu0  ;;  %v485_v49 = vpop.f32.mrb[3].mxu1 }
 0x177   : > { %338 = vst.msk [vmem:[%s193_s6] sm:$0xff] %vm337_vm4, %v336_v47 }
 0x178   : > { %558 = shalt.err (!%p555_p5)
}
 0x179   : > { %s559_s23 = scalar_lea.hbm %s740_s10, 128  ;;  %s563_s28 = scalar_lea.hbm %s790_s3, 256 }
 0x17a   : > { %p560_p6 = scmp.ne.s32.totalorder %s740_s10, %s559_s23  ;;  %p564_p10 = scmp.lt.u32.totalorder %s740_s10, %s790_s3 }
 0x17b   : > { %p565_p11 = scmp.lt.u32.totalorder %s563_s28, %s559_s23  ;;  %p567_p13 = scmp.lt.u32.totalorder %s559_s23, %s740_s10 }
 0x17c   : > { %p561_p7 = pnand %p560_p6, %p689_p4 }
 0x17d   : > { %p566_p12 = por %p565_p11, %p564_p10 }
 0x17e   : > { %p562_p9 = pneg %p561_p7 }
 0x17f   : > { %p568_p0 = por %p567_p13, %p566_p12 }
 0x181   : > { %p569_p1 = pnand %p568_p0, %p562_p9 }
 0x183   : > { %572 = shalt.err (!%p569_p1)
}
 0x184   : > { %486 = dma.vmem_to_hbm [thread:$0]  (%p689_p4), %s742_s7, 128, %s740_s10, %s340_s15  }
 0x185 PF: > { %p492_p2 = scmp.ge.s32.totalorder %s623_s17, 2  ;;  %s366_s4 = sand.u32 1, %s603_s12  }
 0x186   : > { %s367_s5 = scalar_lea.sflag [#allocation3], %s366_s4 }
 0x187   : > { %p489_p3 = pnand %p492_p2, %p696_p8 }
 0x189   : > { %598 = dma.done.wait (!%p489_p3), %s367_s5, 128  }
 0x18a   : > { %600 = vsyncadd (!%p489_p3), %s367_s5, 4294967168  ;;  %s16_s17 = sadd.s32 1, %s623_s17   ;;  %s793_s12 = smov %s607_s13 }
 0x18b   : > { %p13_p5 = scmp.ge.s32.totalorder %s16_s17, 4   ;;  %s794_s13 = smov %s611_s14 }
 0x18c   : > { %s795_s14 = smov %s702_s25  ;;  %s796_s15 = smov %s619_s16 }
 0x18d   : > { %s797_s16 = smov %s799_s20  ;;  %15 = sbr.rel (!%p13_p5) target bundleno = 4 (0x4), region = 70 }
 0x194   :  { %372 = vsyncpa [#allocation3], 1 }
 0x195   :  { %374 = vsyncpa [#allocation3 + $0x1], 1 }

</bundles_post_ra>
